<compile_context>
chip_gen: v6e
topology: v6e:2x2x1
jax: 0.10.0
libtpu: 0.0.40
codegen_flags: <defaults>
</compile_context>

<pallas_src>
import jax
import jax.numpy as jnp
from jax import lax
from jax.experimental import pallas as pl
from jax.experimental.pallas import tpu as pltpu

B = 2          # batch
IN = 10        # in_features
OUT = 10       # out_features

_CONTRACT_IN = (((1,), (1,)), ((), ()))  # x:(B,IN) · w:(OUT,IN) over the IN axis


def linear_mse_kernel(x_ref, w_ref, b_ref, t_ref, y_ref, loss_ref):
    # x_ref: (B, IN), w_ref: (OUT, IN), b_ref: (1, OUT), t_ref: (B, OUT)
    # y_ref: (B, OUT) in VMEM, loss_ref: (1, 1) in SMEM
    x = x_ref[...]
    w = w_ref[...]
    b = b_ref[...]
    # y = x @ W.T + b without materializing a transpose of W (MXU, f32 acc)
    y = lax.dot_general(x, w, dimension_numbers=_CONTRACT_IN,
                        preferred_element_type=jnp.float32) + b
    y_ref[...] = y.astype(y_ref.dtype)
    # MSELoss(reduction='mean'): mean over all elements, scalar lands in SMEM
    diff = y - t_ref[...]
    n_elems = diff.shape[0] * diff.shape[1]
    loss_ref[0, 0] = jnp.sum(diff * diff) / jnp.float32(n_elems)


def linear_kernel(x_ref, w_ref, b_ref, y_ref):
    # Eval path: only the linear layer. No target input, no loss output.
    y = lax.dot_general(x_ref[...], w_ref[...], dimension_numbers=_CONTRACT_IN,
                        preferred_element_type=jnp.float32) + b_ref[...]
    y_ref[...] = y.astype(y_ref.dtype)


_VMEM = pl.BlockSpec(memory_space=pltpu.MemorySpace.VMEM)
_SMEM = pl.BlockSpec(memory_space=pltpu.MemorySpace.SMEM)

_F32 = 4  # bytes per element

_train_call = pl.pallas_call(
    linear_mse_kernel,
    out_shape=(
        jax.ShapeDtypeStruct((B, OUT), jnp.float32),   # fc
        jax.ShapeDtypeStruct((1, 1), jnp.float32),     # loss (scalar, SMEM)
    ),
    in_specs=[_VMEM, _VMEM, _VMEM, _VMEM],             # x, weight, bias, target
    out_specs=(_VMEM, _SMEM),
    cost_estimate=pl.CostEstimate(
        flops=2 * B * IN * OUT + 4 * B * OUT,          # matmul + bias + mse
        transcendentals=0,
        bytes_accessed=_F32 * (B * IN + OUT * IN + OUT + B * OUT  # inputs
                               + B * OUT + 1),                    # outputs
    ),
)

_eval_call = pl.pallas_call(
    linear_kernel,
    out_shape=jax.ShapeDtypeStruct((B, OUT), jnp.float32),
    in_specs=[_VMEM, _VMEM, _VMEM],                    # x, weight, bias
    out_specs=_VMEM,
    cost_estimate=pl.CostEstimate(
        flops=2 * B * IN * OUT + B * OUT,
        transcendentals=0,
        bytes_accessed=_F32 * (B * IN + OUT * IN + OUT + B * OUT),
    ),
)


def init_params(key):
    """nn.Linear(10, 10)-style init, already in kernel layout (bias as (1, OUT))."""
    k_w, k_b = jax.random.split(key)
    bound = 1.0 / (IN ** 0.5)
    weight = jax.random.uniform(k_w, (OUT, IN), jnp.float32, -bound, bound)
    bias2d = jax.random.uniform(k_b, (1, OUT), jnp.float32, -bound, bound)
    return weight, bias2d


def example_model_with_loss(x, weight, bias2d, target=None, training=True):
    """Forward pass of ExampleModelWithLoss.

    training=True  -> (fc, mse_loss(fc, target))
    training=False -> fc only (target unused, loss path never executed)
    """
    if training:
        fc, loss = _train_call(x, weight, bias2d, target)
        return fc, loss[0, 0]
    return _eval_call(x, weight, bias2d)


if __name__ == "__main__":
    key = jax.random.PRNGKey(0)
    k_params, k_x, k_t = jax.random.split(key, 3)

    weight, bias2d = init_params(k_params)          # layout prep hoisted to init
    x = jax.random.normal(k_x, (B, IN), jnp.float32)
    target = jax.random.normal(k_t, (B, OUT), jnp.float32)

    fc, loss = example_model_with_loss(x, weight, bias2d, target, training=True)
    fc_eval = example_model_with_loss(x, weight, bias2d, training=False)
    jax.block_until_ready((fc, loss, fc_eval))

    # Reference check in plain JAX
    fc_ref = x @ weight.T + bias2d[0]
    loss_ref = jnp.mean((fc_ref - target) ** 2)
    assert jnp.allclose(fc, fc_ref, atol=1e-5), "fc (train) mismatch"
    assert jnp.allclose(loss, loss_ref, atol=1e-5), "loss mismatch"
    assert jnp.allclose(fc_eval, fc_ref, atol=1e-5), "fc (eval) mismatch"

    print("KERNEL_OK")
</pallas_src>

<mosaic_0001>
module attributes {stable_mosaic.version = 11 : i64} {
  func.func @linear_mse_kernel(%arg0: memref<2x10xf32, #tpu.memory_space<vmem>>, %arg1: memref<10x10xf32, #tpu.memory_space<vmem>>, %arg2: memref<1x10xf32, #tpu.memory_space<vmem>>, %arg3: memref<2x10xf32, #tpu.memory_space<vmem>>, %arg4: memref<2x10xf32, #tpu.memory_space<vmem>>, %arg5: memref<1x1xf32, #tpu.memory_space<smem>>) attributes {dimension_semantics = [], scalar_prefetch = 0 : i64, scratch_operands = 0 : i64, tpu.core_type = #tpu.core_type<tc>} {
    %c0 = arith.constant 0 : index
    %c0_0 = arith.constant 0 : index
    %0 = vector.load %arg0[%c0, %c0_0] : memref<2x10xf32, #tpu.memory_space<vmem>>, vector<2x10xf32>
    %c0_1 = arith.constant 0 : index
    %c0_2 = arith.constant 0 : index
    %1 = vector.load %arg1[%c0_1, %c0_2] : memref<10x10xf32, #tpu.memory_space<vmem>>, vector<10x10xf32>
    %c0_3 = arith.constant 0 : index
    %c0_4 = arith.constant 0 : index
    %2 = vector.load %arg2[%c0_3, %c0_4] : memref<1x10xf32, #tpu.memory_space<vmem>>, vector<1x10xf32>
    %cst = arith.constant dense<0.000000e+00> : vector<2x10xf32>
    %3 = tpu.matmul %0, %1, %cst {dimension_numbers = #tpu.dot_dimension_numbers<[1], [1], [0], [0], [0, 0, 1, 0], [], []>} : vector<2x10xf32>, vector<10x10xf32>, vector<2x10xf32> -> vector<2x10xf32>
    %4 = vector.broadcast %2 : vector<1x10xf32> to vector<2x10xf32>
    %5 = arith.addf %3, %4 : vector<2x10xf32>
    %c0_5 = arith.constant 0 : index
    %c0_6 = arith.constant 0 : index
    %6 = vector.load %arg4[%c0_5, %c0_6] : memref<2x10xf32, #tpu.memory_space<vmem>>, vector<2x10xf32>
    tpu.vector_store %arg4[%c0_5, %c0_6], %5 {strides = array<i32>} : memref<2x10xf32, #tpu.memory_space<vmem>>, vector<2x10xf32>,
    %c0_7 = arith.constant 0 : index
    %c0_8 = arith.constant 0 : index
    %7 = vector.load %arg3[%c0_7, %c0_8] : memref<2x10xf32, #tpu.memory_space<vmem>>, vector<2x10xf32>
    %8 = arith.subf %5, %7 : vector<2x10xf32>
    %9 = arith.mulf %8, %8 : vector<2x10xf32>
    %10 = vector.shape_cast %9 : vector<2x10xf32> to vector<1x2x10xf32>
    %cst_9 = arith.constant dense<0.000000e+00> : vector<1xf32>
    %11 = vector.multi_reduction <add>, %10, %cst_9 [1, 2] : vector<1x2x10xf32> to vector<1xf32>
    %12 = vector.shape_cast %11 : vector<1xf32> to vector<1x1x1xf32>
    %13 = vector.extract %12[0, 0, 0] : f32 from vector<1x1x1xf32>
    %cst_10 = arith.constant 2.000000e+01 : f32
    %14 = arith.divf %13, %cst_10 : f32
    %c0_11 = arith.constant 0 : index
    %c0_12 = arith.constant 0 : index
    %15 = memref.load %arg5[%c0_11, %c0_12] : memref<1x1xf32, #tpu.memory_space<smem>>
    memref.store %14, %arg5[%c0_11, %c0_12] : memref<1x1xf32, #tpu.memory_space<smem>>
    return
  }
}

</mosaic_0001>

<bundles_post_ra>
// kernel: tpu_custom_call.1
= control target key start
LH: loop header
LB: loop body
LE: loop exit
PB: predicated region body
PF: predicated region fallthrough
CT: control target
= control target key end

     0   :  { %11 = vsyncpa [#allocation3], 0  ;;  %s342_s0 = inlined_call_operand.hbm [shape: f32[2,10], index: 0, kind: input, shape index: {}]   ;;  %s343_s1 = inlined_call_operand.hbm [shape: f32[10,10], index: 1, kind: input, shape index: {}]   ;;  %s344_s2 = inlined_call_operand.vmem [shape: f32[1,10], index: 2, kind: input, shape index: {}]   ;;  %s345_s3 = inlined_call_operand.vmem [shape: f32[2,10], index: 3, kind: input, shape index: {}]   ;;  %s346_s4 = inlined_call_operand.hbm [shape: f32[2,10], index: 4, kind: output, shape index: {0}]   ;;  %s347_s5 = inlined_call_operand.hbm [shape: f32[1,1], index: 5, kind: output, shape index: {1}]  }
   0x1   :  { %12 = vsyncpa [#allocation7], 0 }
   0x2   :  { %13 = vsyncpa [#allocation4], 0 }
   0x3   :  { %14 = vsyncpa [#allocation5], 0  ;;  %s286_s18 = smov [#allocation2]   ;;  %s287_s20 = smov [#allocation6]  }
   0x4   :  { %s21_s19 = sshll.u32 %s286_s18, 4  ;;  %s30_s21 = sshll.u32 %s287_s20, 4  ;;  %s22_s19 = int_to_ptr.vmem [resolvable:$true] %s21_s19  ;;  %s31_s21 = int_to_ptr.vmem [resolvable:$true] %s30_s21 }
   0x5   :  { %s218_s22 = scalar_lea.vmem %s22_s19, 32  ;;  %p223_p1 = scmp.lt.s32.totalorder %s22_s19, %s22_s19 }
   0x6   :  { %p219_p0 = scmp.ne.s32.totalorder %s22_s19, %s218_s22  ;;  %p224_p2 = scmp.lt.s32.totalorder %s218_s22, %s218_s22 }
   0x8   :  { %p225_p3 = por %p224_p2, %p223_p1 }
   0xa   :  { %p226_p4 = pnand %p225_p3, %p219_p0 }
   0xc   :  { %229 = shalt.err (!%p226_p4)
}
   0xd   :  { %24 = dma.hbm_to_vmem [thread:$0]  %s342_s0, 32, %s22_s19, [#allocation3]  }
   0xe   :  { %s238_s25 = scalar_lea.vmem %s31_s21, 256  ;;  %p243_p6 = scmp.lt.s32.totalorder %s31_s21, %s31_s21 }
   0xf   :  { %p239_p5 = scmp.ne.s32.totalorder %s31_s21, %s238_s25  ;;  %p244_p7 = scmp.lt.s32.totalorder %s238_s25, %s238_s25 }
  0x11   :  { %p245_p8 = por %p244_p7, %p243_p6 }
  0x13   :  { %p246_p9 = pnand %p245_p8, %p239_p5 }
  0x15   :  { %249 = shalt.err (!%p246_p9)
}
  0x16   :  { %s288_s26 = smov 128   ;;  %s289_s27 = smov 8  }
  0x17   :  { %36 = dma.hbm_to_vmem [thread:$0]  %s343_s1, 256, %s31_s21, [#allocation7], %s288_s26, %s288_s26, %s289_s27  }
  0x18   :  { %278 = dma.done.wait [#allocation3], 32  }
  0x19   :  { %279 = vsyncadd [#allocation3], 4294967264 }
  0x1a   :  { %280 = dma.done.wait [#allocation7], 256  }
  0x1b   :  { %281 = vsyncadd [#allocation7], 4294967040  ;;  %v290_v0 = vmov 0.0   ;;  %vm291_vm0 = vmmov 0   ;;  %vm57_vm1 = vcmask 80896   ;;  %v48_v2 = vld [vmem:[#allocation6] sm:$0xff] }
  0x1c   :  { %193 = vmatprep.subr.mxu0 %v290_v0  ;;  %197 = vmatprep.mubr.msk.f32.mxu0 %vm291_vm0, %v290_v0  ;;  %v49_v1 = vld [vmem:[#allocation6 + $0x8] sm:$0x3]  ;;  %v47_v3 = vld [vmem:[#allocation2] sm:$0x3]  ;;  %vm137_vm2 = vcmask 74752   ;;  %s292_s7 = smov [#allocation8]  }
  0x1d   :  { %194 = vmatpush3.xpose.msk.msra.mxu0 %vm57_vm1, %v49_v1  ;;  %v186_v4 = vld [vmem:[%s344_s2] ss:$0 sm:$0xff]  ;;  %s163_s8 = sshll.u32 %s292_s7, 4  ;;  %s164_s8 = int_to_ptr.vmem [resolvable:$true] %s163_s8 }
  0x1e   :  { %195 = vmatprep.subr.mxu0 %v290_v0  ;;  %v139_v6 = vld [vmem:[%s345_s3] sm:$0x3]  ;;  %s250_s9 = scalar_lea.vmem %s164_s8, 32  ;;  %p255_p11 = scmp.lt.s32.totalorder %s164_s8, %s164_s8 }
  0x1f   :  { %p251_p10 = scmp.ne.s32.totalorder %s164_s8, %s250_s9  ;;  %p256_p12 = scmp.lt.s32.totalorder %s250_s9, %s250_s9 }
  0x21   :  { %196 = vmatpush3.xpose.msk.msra.mxu0 %vm57_vm1, %v48_v2  ;;  %p257_p13 = por %p256_p12, %p255_p11 }
  0x23   :  { %p258_p0 = pnand %p257_p13, %p251_p10 }
  0x24   :  { %198 = vmatmul.mubr.msk.f32.vlgmr.msra.gmra.mxu0 %vm57_vm1, %v47_v3 }
  0xe4   :  { %v133_v5 = vpop.f32.mrf.mxu0 }
  0xe5   :  { %v134_v7 = vadd.f32 %v186_v4, %v133_v5 }
  0xe6   :  { %v199_v8 = vpop.f32.mrf.mxu0 }
  0xe7   :  { %v140_v9 = vsub.f32 %v134_v7, %v139_v6  ;;  %138 = vst.msk [vmem:[#allocation8] sm:$0x3] %vm137_vm2, %v134_v7 }
  0xe9   :  { %v141_v10 = vmul.f32 %v140_v9, %v140_v9 }
  0xeb   :  { %v142_v11 = vsel %vm137_vm2, %v141_v10, 0.0 }
  0xec   :  { %143 = vadd.xlane.f32.xlu0 %v142_v11 }
  0xed   :  { %261 = shalt.err (!%p258_p0)
}
  0xee   :  { %166 = dma.vmem_to_hbm [thread:$0]  %s164_s8, 32, %s346_s4, [#allocation4]  }
  0xef   :  { %s293_s12 = smov [#allocation9]  }
 0x175   :  { %v144_v12 = vpop.xlane.xlu0 %143 }
 0x176   :  { %v145_v13 = vrot.slane %v144_v12, 4 }
 0x178   :  { %v146_v14 = vadd.f32 %v145_v13, %v144_v12 }
 0x17a   :  { %v147_v15 = vrot.slane %v146_v14, 2 }
 0x17c   :  { %v148_v16 = vadd.f32 %v147_v15, %v146_v14 }
 0x17e   :  { %v149_v17 = vrot.slane %v148_v16, 1 }
 0x180   :  { %v150_v18 = vadd.f32 %v149_v17, %v148_v16 }
 0x182   :  { %200 = vpush %v150_v18 }
 0x1b3   :  { %s201_s3 = spop %200 }
 0x1b4   :  { %s154_s11 = smul.f32 0.05, %s201_s3 }
 0x1b6   :  { %156 = sst [smem:[#allocation9]] %s154_s11 }
 0x1b7   :  { %174 = dma.smem_to_hbm %s293_s12, 16, %s347_s5, [#allocation5]  }
 0x1b8   :  { %282 = dma.done.wait [#allocation4], 32  }
 0x1b9   :  { %283 = vsyncadd [#allocation4], 4294967264 }
 0x1ba   :  { %284 = dma.done.wait [#allocation5], 16  }
 0x1bb   :  { %285 = vsyncadd [#allocation5], 4294967280 }
 0x1bc   :  { %181 = sfence }
 0x1bd   :  { %182 = vsyncpa [#allocation3], 1 }
 0x1be   :  { %183 = vsyncpa [#allocation7], 1 }
 0x1bf   :  { %184 = vsyncpa [#allocation4], 1 }
 0x1c0   :  { %185 = vsyncpa [#allocation5], 1 }

</bundles_post_ra>
